<compile_context>
chip_gen: v7x
topology: tpu7x:2x2x1
jax: 0.10.0
libtpu: 0.0.40
codegen_flags: <defaults>
</compile_context>

<pallas_src>
import jax
import jax.numpy as jnp
import numpy as np
from jax import lax
from jax.experimental import pallas as pl
from jax.experimental.pallas import tpu as pltpu

EPS = 1e-5
SLOPE = 0.2


def _lrelu(x):
    return jnp.where(x > 0, x, SLOPE * x)


def _fused_residual_kernel(x_ref, band1_ref, band2_ref, g1_ref, b1_ref,
                           g2_ref, b2_ref, pool_ref, poolT_ref,
                           o_ref, pad_ref):
    """Fused conv1->bn1->lrelu->conv2->bn2->(+x)->lrelu.

    x_ref/o_ref : (N, H, W*C)      lane-dense activation slabs
    band*_ref   : (3, W*C, W*C)    banded conv weights, one per ky tap
    g*/b*_ref   : (1, C)           BN gamma / beta
    pool_ref    : (W*C, C)         0/1 channel-pooling matrix; poolT its transpose
    pad_ref     : (N, H+2, W*C)    VMEM scratch (H halo), reused by both stages
    """
    N, H, WC = x_ref.shape
    C = g1_ref.shape[-1]
    W = WC // C
    ROWS = N * H
    inv_m = 1.0 / float(N * H * W)

    pool = pool_ref[...]
    poolT = poolT_ref[...]

    def conv3x3_bn(band_ref, g, b):
        # 3x3 "same" conv as 3 banded MXU matmuls over the lane-dense slab (K = W*C).
        acc = jnp.zeros((ROWS, WC), jnp.float32)
        for ky in range(3):                                   # unrolled
            slab = pad_ref[:, ky:ky + H, :].reshape(ROWS, WC)
            acc += jnp.dot(slab, band_ref[ky],
                           preferred_element_type=jnp.float32)
        # Training-mode BatchNorm (biased variance).  Per-channel stats are pooled
        # across the W replicas in the lane axis with tiny MXU matmuls; the affine
        # is folded to one scale + one shift per lane.
        mean_c = jnp.dot(jnp.sum(acc, axis=0, keepdims=True), pool,
                         preferred_element_type=jnp.float32) * inv_m      # (1, C)
        d = acc - jnp.dot(mean_c, poolT, preferred_element_type=jnp.float32)
        var_c = jnp.dot(jnp.sum(d * d, axis=0, keepdims=True), pool,
                        preferred_element_type=jnp.float32) * inv_m       # (1, C)
        s_lane = jnp.dot(g * lax.rsqrt(var_c + EPS), poolT,
                         preferred_element_type=jnp.float32)              # (1, WC)
        b_lane = jnp.dot(b, poolT, preferred_element_type=jnp.float32)    # (1, WC)
        return d * s_lane + b_lane

    # ---- stage 1: in-kernel H halo, conv1 -> bn1 -> lrelu (y stays in VMEM) ----
    pad_ref[...] = jnp.zeros_like(pad_ref)
    pad_ref[:, 1:H + 1, :] = x_ref[...]
    y = _lrelu(conv3x3_bn(band1_ref, g1_ref[...], b1_ref[...]))           # (ROWS, WC)

    # ---- stage 2: conv2 -> bn2 -> +residual -> lrelu (halo rows still zero) ----
    pad_ref[:, 1:H + 1, :] = y.reshape(N, H, WC)
    z = conv3x3_bn(band2_ref, g2_ref[...], b2_ref[...])
    z = z + x_ref[...].reshape(ROWS, WC)
    o_ref[...] = _lrelu(z).reshape(N, H, WC)


def _band_weights(w_hwio, width):
    """Fold the kx taps of a (3,3,Cin,Cout) HWIO weight into banded
    (W*Cin, W*Cout) matrices, one per ky; zero-padding along W is implicit
    in the band structure (missing diagonals contribute zero)."""
    bands = []
    for ky in range(3):
        b = sum(jnp.kron(jnp.eye(width, k=-(kx - 1), dtype=w_hwio.dtype),
                         w_hwio[ky, kx])
                for kx in range(3))
        bands.append(b)
    return jnp.stack(bands)                                   # (3, W*C, W*C)


def _vmem_specs(n):
    return [pl.BlockSpec(memory_space=pltpu.MemorySpace.VMEM) for _ in range(n)]


def residual_block_nhwc(x, w1, w2, g1, b1, g2, b2):
    """x: (N,H,W,C) f32; w*: (3,3,Cin,Cout) HWIO (PyTorch OIHW -> transpose(2,3,1,0));
    g*/b*: (C,).  Residual add requires Cin == Cout."""
    N, H, W, C = x.shape
    WC = W * C

    band1 = _band_weights(w1, W)
    band2 = _band_weights(w2, W)
    pool = jnp.kron(jnp.ones((W, 1), x.dtype), jnp.eye(C, dtype=x.dtype))  # (WC, C)
    poolT = pool.T

    # TODO(synk): for shapes where the (N*H, W*C) slab / banded weights no longer fit
    # VMEM (notably v7x's 64 MiB), add a row-block grid with resident sum/sumsq
    # accumulators and a two-pass BN instead of this single-block kernel.
    out = pl.pallas_call(
        _fused_residual_kernel,
        out_shape=jax.ShapeDtypeStruct((N, H, WC), jnp.float32),
        in_specs=_vmem_specs(9),
        out_specs=pl.BlockSpec(memory_space=pltpu.MemorySpace.VMEM),
        scratch_shapes=[pltpu.VMEM((N, H + 2, WC), jnp.float32)],
        compiler_params=pltpu.CompilerParams(vmem_limit_bytes=32 * 1024 * 1024),
    )(x.reshape(N, H, WC), band1, band2,
      g1.reshape(1, C), b1.reshape(1, C), g2.reshape(1, C), b2.reshape(1, C),
      pool, poolT)
    return out.reshape(N, H, W, C)


@jax.jit
def residual_block_nchw(x_nchw, w1, w2, g1, b1, g2, b2):
    """PyTorch-facing wrapper: NCHW in / NCHW out."""
    x = jnp.transpose(x_nchw, (0, 2, 3, 1))
    y = residual_block_nhwc(x, w1, w2, g1, b1, g2, b2)
    return jnp.transpose(y, (0, 3, 1, 2))


def reference_nhwc(x, w1, w2, g1, b1, g2, b2):
    """Plain-JAX reference (matches PyTorch training-mode forward)."""
    def conv(a, w):
        return lax.conv_general_dilated(
            a, w, window_strides=(1, 1), padding='SAME',
            dimension_numbers=('NHWC', 'HWIO', 'NHWC'),
            precision=lax.Precision.HIGHEST)

    def bn(a, g, b):
        m = jnp.mean(a, axis=(0, 1, 2), keepdims=True)
        v = jnp.mean((a - m) ** 2, axis=(0, 1, 2), keepdims=True)
        return (a - m) * lax.rsqrt(v + EPS) * g + b

    y = jax.nn.leaky_relu(bn(conv(x, w1), g1, b1), SLOPE)
    z = bn(conv(y, w2), g2, b2) + x
    return jax.nn.leaky_relu(z, SLOPE)


if __name__ == "__main__":
    N, C, H, W = 2, 8, 16, 16          # residual add requires in_channels == out_channels
    key = jax.random.PRNGKey(0)
    kx, k1, k2 = jax.random.split(key, 3)

    x_nchw = jax.random.normal(kx, (N, C, H, W), jnp.float32)
    # Conv weights (synthetic deterministic init), laid out directly as HWIO.
    w1 = 0.1 * jax.random.normal(k1, (3, 3, C, C), jnp.float32)
    w2 = 0.1 * jax.random.normal(k2, (3, 3, C, C), jnp.float32)
    # BatchNorm affine params as constructed by nn.BatchNorm2d.__init__.
    g1 = jnp.ones((C,), jnp.float32)
    b1 = jnp.zeros((C,), jnp.float32)
    g2 = jnp.ones((C,), jnp.float32)
    b2 = jnp.zeros((C,), jnp.float32)

    out = jax.block_until_ready(
        residual_block_nchw(x_nchw, w1, w2, g1, b1, g2, b2))

    x_nhwc = jnp.transpose(x_nchw, (0, 2, 3, 1))
    ref = jnp.transpose(reference_nhwc(x_nhwc, w1, w2, g1, b1, g2, b2),
                        (0, 3, 1, 2))
    np.testing.assert_allclose(np.asarray(out), np.asarray(ref),
                               rtol=1e-3, atol=1e-3)
    print("KERNEL_OK")
</pallas_src>

<mosaic_0001>
module attributes {stable_mosaic.version = 11 : i64} {
  func.func @_fused_residual_kernel(%arg0: memref<2x16x128xf32, #tpu.memory_space<vmem>>, %arg1: memref<3x128x128xf32, #tpu.memory_space<vmem>>, %arg2: memref<3x128x128xf32, #tpu.memory_space<vmem>>, %arg3: memref<1x8xf32, #tpu.memory_space<vmem>>, %arg4: memref<1x8xf32, #tpu.memory_space<vmem>>, %arg5: memref<1x8xf32, #tpu.memory_space<vmem>>, %arg6: memref<1x8xf32, #tpu.memory_space<vmem>>, %arg7: memref<128x8xf32, #tpu.memory_space<vmem>>, %arg8: memref<8x128xf32, #tpu.memory_space<vmem>>, %arg9: memref<2x16x128xf32, #tpu.memory_space<vmem>>, %arg10: memref<2x18x128xf32, #tpu.memory_space<vmem>>) attributes {dimension_semantics = [], scalar_prefetch = 0 : i64, scratch_operands = 1 : i64, tpu.core_type = #tpu.core_type<tc>} {
    %c0 = arith.constant 0 : index
    %c0_0 = arith.constant 0 : index
    %0 = vector.load %arg7[%c0, %c0_0] : memref<128x8xf32, #tpu.memory_space<vmem>>, vector<128x8xf32>
    %c0_1 = arith.constant 0 : index
    %c0_2 = arith.constant 0 : index
    %1 = vector.load %arg8[%c0_1, %c0_2] : memref<8x128xf32, #tpu.memory_space<vmem>>, vector<8x128xf32>
    %cst = arith.constant 0.000000e+00 : f32
    %2 = vector.broadcast %cst : f32 to vector<2x18x128xf32>
    %c0_3 = arith.constant 0 : index
    %c0_4 = arith.constant 0 : index
    %c0_5 = arith.constant 0 : index
    %3 = vector.load %arg10[%c0_3, %c0_4, %c0_5] : memref<2x18x128xf32, #tpu.memory_space<vmem>>, vector<2x18x128xf32>
    tpu.vector_store %arg10[%c0_3, %c0_4, %c0_5], %2 {strides = array<i32>} : memref<2x18x128xf32, #tpu.memory_space<vmem>>, vector<2x18x128xf32>,
    %c0_6 = arith.constant 0 : index
    %c0_7 = arith.constant 0 : index
    %c0_8 = arith.constant 0 : index
    %4 = vector.load %arg0[%c0_6, %c0_7, %c0_8] : memref<2x16x128xf32, #tpu.memory_space<vmem>>, vector<2x16x128xf32>
    %c0_9 = arith.constant 0 : index
    %c1 = arith.constant 1 : index
    %c0_10 = arith.constant 0 : index
    %5 = vector.load %arg10[%c0_9, %c1, %c0_10] : memref<2x18x128xf32, #tpu.memory_space<vmem>>, vector<2x16x128xf32>
    tpu.vector_store %arg10[%c0_9, %c1, %c0_10], %4 {strides = array<i32>} : memref<2x18x128xf32, #tpu.memory_space<vmem>>, vector<2x16x128xf32>,
    %c0_11 = arith.constant 0 : index
    %c0_12 = arith.constant 0 : index
    %6 = vector.load %arg3[%c0_11, %c0_12] : memref<1x8xf32, #tpu.memory_space<vmem>>, vector<1x8xf32>
    %c0_13 = arith.constant 0 : index
    %c0_14 = arith.constant 0 : index
    %7 = vector.load %arg4[%c0_13, %c0_14] : memref<1x8xf32, #tpu.memory_space<vmem>>, vector<1x8xf32>
    %cst_15 = arith.constant 0.000000e+00 : f32
    %8 = vector.broadcast %cst_15 : f32 to vector<32x128xf32>
    %c0_16 = arith.constant 0 : index
    %c0_17 = arith.constant 0 : index
    %c0_18 = arith.constant 0 : index
    %9 = vector.load %arg10[%c0_16, %c0_17, %c0_18] : memref<2x18x128xf32, #tpu.memory_space<vmem>>, vector<2x16x128xf32>
    %10 = vector.shape_cast %9 : vector<2x16x128xf32> to vector<32x128xf32>
    %c0_19 = arith.constant 0 : index
    %c0_20 = arith.constant 0 : index
    %c0_21 = arith.constant 0 : index
    %11 = vector.load %arg1[%c0_19, %c0_20, %c0_21] : memref<3x128x128xf32, #tpu.memory_space<vmem>>, vector<1x128x128xf32>
    %12 = vector.shape_cast %11 : vector<1x128x128xf32> to vector<128x128xf32>
    %cst_22 = arith.constant dense<0.000000e+00> : vector<32x128xf32>
    %13 = tpu.matmul %10, %12, %cst_22 {dimension_numbers = #tpu.dot_dimension_numbers<[1], [0], [0], [1], [0, 0, 1, 1], [], []>} : vector<32x128xf32>, vector<128x128xf32>, vector<32x128xf32> -> vector<32x128xf32>
    %14 = arith.addf %8, %13 : vector<32x128xf32>
    %c0_23 = arith.constant 0 : index
    %c1_24 = arith.constant 1 : index
    %c0_25 = arith.constant 0 : index
    %15 = vector.load %arg10[%c0_23, %c1_24, %c0_25] : memref<2x18x128xf32, #tpu.memory_space<vmem>>, vector<2x16x128xf32>
    %16 = vector.shape_cast %15 : vector<2x16x128xf32> to vector<32x128xf32>
    %c1_26 = arith.constant 1 : index
    %c0_27 = arith.constant 0 : index
    %c0_28 = arith.constant 0 : index
    %17 = vector.load %arg1[%c1_26, %c0_27, %c0_28] : memref<3x128x128xf32, #tpu.memory_space<vmem>>, vector<1x128x128xf32>
    %18 = vector.shape_cast %17 : vector<1x128x128xf32> to vector<128x128xf32>
    %cst_29 = arith.constant dense<0.000000e+00> : vector<32x128xf32>
    %19 = tpu.matmul %16, %18, %cst_29 {dimension_numbers = #tpu.dot_dimension_numbers<[1], [0], [0], [1], [0, 0, 1, 1], [], []>} : vector<32x128xf32>, vector<128x128xf32>, vector<32x128xf32> -> vector<32x128xf32>
    %20 = arith.addf %14, %19 : vector<32x128xf32>
    %c0_30 = arith.constant 0 : index
    %c2 = arith.constant 2 : index
    %c0_31 = arith.constant 0 : index
    %21 = vector.load %arg10[%c0_30, %c2, %c0_31] : memref<2x18x128xf32, #tpu.memory_space<vmem>>, vector<2x16x128xf32>
    %22 = vector.shape_cast %21 : vector<2x16x128xf32> to vector<32x128xf32>
    %c2_32 = arith.constant 2 : index
    %c0_33 = arith.constant 0 : index
    %c0_34 = arith.constant 0 : index
    %23 = vector.load %arg1[%c2_32, %c0_33, %c0_34] : memref<3x128x128xf32, #tpu.memory_space<vmem>>, vector<1x128x128xf32>
    %24 = vector.shape_cast %23 : vector<1x128x128xf32> to vector<128x128xf32>
    %cst_35 = arith.constant dense<0.000000e+00> : vector<32x128xf32>
    %25 = tpu.matmul %22, %24, %cst_35 {dimension_numbers = #tpu.dot_dimension_numbers<[1], [0], [0], [1], [0, 0, 1, 1], [], []>} : vector<32x128xf32>, vector<128x128xf32>, vector<32x128xf32> -> vector<32x128xf32>
    %26 = arith.addf %20, %25 : vector<32x128xf32>
    %cst_36 = arith.constant dense<0.000000e+00> : vector<128xf32>
    %27 = vector.multi_reduction <add>, %26, %cst_36 [0] : vector<32x128xf32> to vector<128xf32>
    %28 = vector.shape_cast %27 : vector<128xf32> to vector<1x128xf32>
    %cst_37 = arith.constant dense<0.000000e+00> : vector<1x8xf32>
    %29 = tpu.matmul %28, %0, %cst_37 {dimension_numbers = #tpu.dot_dimension_numbers<[1], [0], [0], [1], [0, 0, 1, 1], [], []>} : vector<1x128xf32>, vector<128x8xf32>, vector<1x8xf32> -> vector<1x8xf32>
    %cst_38 = arith.constant 0.001953125 : f32
    %30 = vector.broadcast %cst_38 : f32 to vector<1x8xf32>
    %31 = arith.mulf %29, %30 : vector<1x8xf32>
    %cst_39 = arith.constant dense<0.000000e+00> : vector<1x128xf32>
    %32 = tpu.matmul %31, %1, %cst_39 {dimension_numbers = #tpu.dot_dimension_numbers<[1], [0], [0], [1], [0, 0, 1, 1], [], []>} : vector<1x8xf32>, vector<8x128xf32>, vector<1x128xf32> -> vector<1x128xf32>
    %33 = vector.broadcast %32 : vector<1x128xf32> to vector<32x128xf32>
    %34 = arith.subf %26, %33 : vector<32x128xf32>
    %35 = arith.mulf %34, %34 : vector<32x128xf32>
    %cst_40 = arith.constant dense<0.000000e+00> : vector<128xf32>
    %36 = vector.multi_reduction <add>, %35, %cst_40 [0] : vector<32x128xf32> to vector<128xf32>
    %37 = vector.shape_cast %36 : vector<128xf32> to vector<1x128xf32>
    %cst_41 = arith.constant dense<0.000000e+00> : vector<1x8xf32>
    %38 = tpu.matmul %37, %0, %cst_41 {dimension_numbers = #tpu.dot_dimension_numbers<[1], [0], [0], [1], [0, 0, 1, 1], [], []>} : vector<1x128xf32>, vector<128x8xf32>, vector<1x8xf32> -> vector<1x8xf32>
    %cst_42 = arith.constant 0.001953125 : f32
    %39 = vector.broadcast %cst_42 : f32 to vector<1x8xf32>
    %40 = arith.mulf %38, %39 : vector<1x8xf32>
    %cst_43 = arith.constant 9.99999974E-6 : f32
    %41 = vector.broadcast %cst_43 : f32 to vector<1x8xf32>
    %42 = arith.addf %40, %41 : vector<1x8xf32>
    %43 = math.rsqrt %42 : vector<1x8xf32>
    %44 = arith.mulf %6, %43 : vector<1x8xf32>
    %cst_44 = arith.constant dense<0.000000e+00> : vector<1x128xf32>
    %45 = tpu.matmul %44, %1, %cst_44 {dimension_numbers = #tpu.dot_dimension_numbers<[1], [0], [0], [1], [0, 0, 1, 1], [], []>} : vector<1x8xf32>, vector<8x128xf32>, vector<1x128xf32> -> vector<1x128xf32>
    %cst_45 = arith.constant dense<0.000000e+00> : vector<1x128xf32>
    %46 = tpu.matmul %7, %1, %cst_45 {dimension_numbers = #tpu.dot_dimension_numbers<[1], [0], [0], [1], [0, 0, 1, 1], [], []>} : vector<1x8xf32>, vector<8x128xf32>, vector<1x128xf32> -> vector<1x128xf32>
    %47 = vector.broadcast %45 : vector<1x128xf32> to vector<32x128xf32>
    %48 = arith.mulf %34, %47 : vector<32x128xf32>
    %49 = vector.broadcast %46 : vector<1x128xf32> to vector<32x128xf32>
    %50 = arith.addf %48, %49 : vector<32x128xf32>
    %cst_46 = arith.constant 0.000000e+00 : f32
    %51 = vector.broadcast %cst_46 : f32 to vector<32x128xf32>
    %52 = arith.cmpf ogt, %50, %51 : vector<32x128xf32>
    %cst_47 = arith.constant 2.000000e-01 : f32
    %53 = vector.broadcast %cst_47 : f32 to vector<32x128xf32>
    %54 = arith.mulf %53, %50 : vector<32x128xf32>
    %55 = arith.select %52, %50, %54 : vector<32x128xi1>, vector<32x128xf32>
    %56 = vector.shape_cast %55 : vector<32x128xf32> to vector<2x16x128xf32>
    %c0_48 = arith.constant 0 : index
    %c1_49 = arith.constant 1 : index
    %c0_50 = arith.constant 0 : index
    %57 = vector.load %arg10[%c0_48, %c1_49, %c0_50] : memref<2x18x128xf32, #tpu.memory_space<vmem>>, vector<2x16x128xf32>
    tpu.vector_store %arg10[%c0_48, %c1_49, %c0_50], %56 {strides = array<i32>} : memref<2x18x128xf32, #tpu.memory_space<vmem>>, vector<2x16x128xf32>,
    %c0_51 = arith.constant 0 : index
    %c0_52 = arith.constant 0 : index
    %58 = vector.load %arg5[%c0_51, %c0_52] : memref<1x8xf32, #tpu.memory_space<vmem>>, vector<1x8xf32>
    %c0_53 = arith.constant 0 : index
    %c0_54 = arith.constant 0 : index
    %59 = vector.load %arg6[%c0_53, %c0_54] : memref<1x8xf32, #tpu.memory_space<vmem>>, vector<1x8xf32>
    %cst_55 = arith.constant 0.000000e+00 : f32
    %60 = vector.broadcast %cst_55 : f32 to vector<32x128xf32>
    %c0_56 = arith.constant 0 : index
    %c0_57 = arith.constant 0 : index
    %c0_58 = arith.constant 0 : index
    %61 = vector.load %arg10[%c0_56, %c0_57, %c0_58] : memref<2x18x128xf32, #tpu.memory_space<vmem>>, vector<2x16x128xf32>
    %62 = vector.shape_cast %61 : vector<2x16x128xf32> to vector<32x128xf32>
    %c0_59 = arith.constant 0 : index
    %c0_60 = arith.constant 0 : index
    %c0_61 = arith.constant 0 : index
    %63 = vector.load %arg2[%c0_59, %c0_60, %c0_61] : memref<3x128x128xf32, #tpu.memory_space<vmem>>, vector<1x128x128xf32>
    %64 = vector.shape_cast %63 : vector<1x128x128xf32> to vector<128x128xf32>
    %cst_62 = arith.constant dense<0.000000e+00> : vector<32x128xf32>
    %65 = tpu.matmul %62, %64, %cst_62 {dimension_numbers = #tpu.dot_dimension_numbers<[1], [0], [0], [1], [0, 0, 1, 1], [], []>} : vector<32x128xf32>, vector<128x128xf32>, vector<32x128xf32> -> vector<32x128xf32>
    %66 = arith.addf %60, %65 : vector<32x128xf32>
    %c0_63 = arith.constant 0 : index
    %c1_64 = arith.constant 1 : index
    %c0_65 = arith.constant 0 : index
    %67 = vector.load %arg10[%c0_63, %c1_64, %c0_65] : memref<2x18x128xf32, #tpu.memory_space<vmem>>, vector<2x16x128xf32>
    %68 = vector.shape_cast %67 : vector<2x16x128xf32> to vector<32x128xf32>
    %c1_66 = arith.constant 1 : index
    %c0_67 = arith.constant 0 : index
    %c0_68 = arith.constant 0 : index
    %69 = vector.load %arg2[%c1_66, %c0_67, %c0_68] : memref<3x128x128xf32, #tpu.memory_space<vmem>>, vector<1x128x128xf32>
    %70 = vector.shape_cast %69 : vector<1x128x128xf32> to vector<128x128xf32>
    %cst_69 = arith.constant dense<0.000000e+00> : vector<32x128xf32>
    %71 = tpu.matmul %68, %70, %cst_69 {dimension_numbers = #tpu.dot_dimension_numbers<[1], [0], [0], [1], [0, 0, 1, 1], [], []>} : vector<32x128xf32>, vector<128x128xf32>, vector<32x128xf32> -> vector<32x128xf32>
    %72 = arith.addf %66, %71 : vector<32x128xf32>
    %c0_70 = arith.constant 0 : index
    %c2_71 = arith.constant 2 : index
    %c0_72 = arith.constant 0 : index
    %73 = vector.load %arg10[%c0_70, %c2_71, %c0_72] : memref<2x18x128xf32, #tpu.memory_space<vmem>>, vector<2x16x128xf32>
    %74 = vector.shape_cast %73 : vector<2x16x128xf32> to vector<32x128xf32>
    %c2_73 = arith.constant 2 : index
    %c0_74 = arith.constant 0 : index
    %c0_75 = arith.constant 0 : index
    %75 = vector.load %arg2[%c2_73, %c0_74, %c0_75] : memref<3x128x128xf32, #tpu.memory_space<vmem>>, vector<1x128x128xf32>
    %76 = vector.shape_cast %75 : vector<1x128x128xf32> to vector<128x128xf32>
    %cst_76 = arith.constant dense<0.000000e+00> : vector<32x128xf32>
    %77 = tpu.matmul %74, %76, %cst_76 {dimension_numbers = #tpu.dot_dimension_numbers<[1], [0], [0], [1], [0, 0, 1, 1], [], []>} : vector<32x128xf32>, vector<128x128xf32>, vector<32x128xf32> -> vector<32x128xf32>
    %78 = arith.addf %72, %77 : vector<32x128xf32>
    %cst_77 = arith.constant dense<0.000000e+00> : vector<128xf32>
    %79 = vector.multi_reduction <add>, %78, %cst_77 [0] : vector<32x128xf32> to vector<128xf32>
    %80 = vector.shape_cast %79 : vector<128xf32> to vector<1x128xf32>
    %cst_78 = arith.constant dense<0.000000e+00> : vector<1x8xf32>
    %81 = tpu.matmul %80, %0, %cst_78 {dimension_numbers = #tpu.dot_dimension_numbers<[1], [0], [0], [1], [0, 0, 1, 1], [], []>} : vector<1x128xf32>, vector<128x8xf32>, vector<1x8xf32> -> vector<1x8xf32>
    %cst_79 = arith.constant 0.001953125 : f32
    %82 = vector.broadcast %cst_79 : f32 to vector<1x8xf32>
    %83 = arith.mulf %81, %82 : vector<1x8xf32>
    %cst_80 = arith.constant dense<0.000000e+00> : vector<1x128xf32>
    %84 = tpu.matmul %83, %1, %cst_80 {dimension_numbers = #tpu.dot_dimension_numbers<[1], [0], [0], [1], [0, 0, 1, 1], [], []>} : vector<1x8xf32>, vector<8x128xf32>, vector<1x128xf32> -> vector<1x128xf32>
    %85 = vector.broadcast %84 : vector<1x128xf32> to vector<32x128xf32>
    %86 = arith.subf %78, %85 : vector<32x128xf32>
    %87 = arith.mulf %86, %86 : vector<32x128xf32>
    %cst_81 = arith.constant dense<0.000000e+00> : vector<128xf32>
    %88 = vector.multi_reduction <add>, %87, %cst_81 [0] : vector<32x128xf32> to vector<128xf32>
    %89 = vector.shape_cast %88 : vector<128xf32> to vector<1x128xf32>
    %cst_82 = arith.constant dense<0.000000e+00> : vector<1x8xf32>
    %90 = tpu.matmul %89, %0, %cst_82 {dimension_numbers = #tpu.dot_dimension_numbers<[1], [0], [0], [1], [0, 0, 1, 1], [], []>} : vector<1x128xf32>, vector<128x8xf32>, vector<1x8xf32> -> vector<1x8xf32>
    %cst_83 = arith.constant 0.001953125 : f32
    %91 = vector.broadcast %cst_83 : f32 to vector<1x8xf32>
    %92 = arith.mulf %90, %91 : vector<1x8xf32>
    %cst_84 = arith.constant 9.99999974E-6 : f32
    %93 = vector.broadcast %cst_84 : f32 to vector<1x8xf32>
    %94 = arith.addf %92, %93 : vector<1x8xf32>
    %95 = math.rsqrt %94 : vector<1x8xf32>
    %96 = arith.mulf %58, %95 : vector<1x8xf32>
    %cst_85 = arith.constant dense<0.000000e+00> : vector<1x128xf32>
    %97 = tpu.matmul %96, %1, %cst_85 {dimension_numbers = #tpu.dot_dimension_numbers<[1], [0], [0], [1], [0, 0, 1, 1], [], []>} : vector<1x8xf32>, vector<8x128xf32>, vector<1x128xf32> -> vector<1x128xf32>
    %cst_86 = arith.constant dense<0.000000e+00> : vector<1x128xf32>
    %98 = tpu.matmul %59, %1, %cst_86 {dimension_numbers = #tpu.dot_dimension_numbers<[1], [0], [0], [1], [0, 0, 1, 1], [], []>} : vector<1x8xf32>, vector<8x128xf32>, vector<1x128xf32> -> vector<1x128xf32>
    %99 = vector.broadcast %97 : vector<1x128xf32> to vector<32x128xf32>
    %100 = arith.mulf %86, %99 : vector<32x128xf32>
    %101 = vector.broadcast %98 : vector<1x128xf32> to vector<32x128xf32>
    %102 = arith.addf %100, %101 : vector<32x128xf32>
    %c0_87 = arith.constant 0 : index
    %c0_88 = arith.constant 0 : index
    %c0_89 = arith.constant 0 : index
    %103 = vector.load %arg0[%c0_87, %c0_88, %c0_89] : memref<2x16x128xf32, #tpu.memory_space<vmem>>, vector<2x16x128xf32>
    %104 = vector.shape_cast %103 : vector<2x16x128xf32> to vector<32x128xf32>
    %105 = arith.addf %102, %104 : vector<32x128xf32>
    %cst_90 = arith.constant 0.000000e+00 : f32
    %106 = vector.broadcast %cst_90 : f32 to vector<32x128xf32>
    %107 = arith.cmpf ogt, %105, %106 : vector<32x128xf32>
    %cst_91 = arith.constant 2.000000e-01 : f32
    %108 = vector.broadcast %cst_91 : f32 to vector<32x128xf32>
    %109 = arith.mulf %108, %105 : vector<32x128xf32>
    %110 = arith.select %107, %105, %109 : vector<32x128xi1>, vector<32x128xf32>
    %111 = vector.shape_cast %110 : vector<32x128xf32> to vector<2x16x128xf32>
    %c0_92 = arith.constant 0 : index
    %c0_93 = arith.constant 0 : index
    %c0_94 = arith.constant 0 : index
    %112 = vector.load %arg9[%c0_92, %c0_93, %c0_94] : memref<2x16x128xf32, #tpu.memory_space<vmem>>, vector<2x16x128xf32>
    tpu.vector_store %arg9[%c0_92, %c0_93, %c0_94], %111 {strides = array<i32>} : memref<2x16x128xf32, #tpu.memory_space<vmem>>, vector<2x16x128xf32>,
    return
  }
}

</mosaic_0001>

<bundles_post_ra>
// kernel: residual_block_nchw.1
= control target key start
LH: loop header
LB: loop body
LE: loop exit
PB: predicated region body
PF: predicated region fallthrough
CT: control target
= control target key end

     0   :  { %v2553_v3 = vmov 0.0   ;;  %v2554_v4 = vmov 0.0|0.0   ;;  %vm2555_vm0 = vmmov 0   ;;  %vm466_vm1 = vcmask 64512   ;;  %s3151_s1 = inlined_call_operand.vmem [shape: f32[3,128,128], index: 1, kind: input, shape index: {}]   ;;  %s3152_s0 = inlined_call_operand.vmem [shape: f32[2,16,128], index: 0, kind: input, shape index: {}]   ;;  %s3153_s7 = inlined_call_operand.vmem [shape: f32[128,8], index: 7, kind: input, shape index: {}]   ;;  %s3154_s8 = inlined_call_operand.vmem [shape: f32[8,128], index: 8, kind: input, shape index: {}]   ;;  %s3155_s3 = inlined_call_operand.vmem [shape: f32[1,8], index: 3, kind: input, shape index: {}]   ;;  %s3156_s2 = inlined_call_operand.vmem [shape: f32[3,128,128], index: 2, kind: input, shape index: {}]   ;;  %s3157_s4 = inlined_call_operand.vmem [shape: f32[1,8], index: 4, kind: input, shape index: {}]   ;;  %s3158_s5 = inlined_call_operand.vmem [shape: f32[1,8], index: 5, kind: input, shape index: {}]   ;;  %s3159_s6 = inlined_call_operand.vmem [shape: f32[1,8], index: 6, kind: input, shape index: {}]   ;;  %s3160_s9 = inlined_call_operand.vmem [shape: f32[2,16,128], index: 9, kind: output, shape index: {}]  }
   0x1   :  { %v1574_v0 = vld [vmem:[%s3151_s1 + $0x80] sm:$0xff]  ;;  %v1575_v1 = vld [vmem:[%s3151_s1 + $0x88] sm:$0xff]  ;;  %v1576_v2 = vld [vmem:[%s3151_s1 + $0x90] sm:$0xff]  ;;  %49 = vst [vmem:[#allocation2] sm:$0xff] %v2553_v3  ;;  %2338 = vmatprep.subr.bf16.mxu1 %v2554_v4  ;;  %1990 = vmatprep.mubr.msk.f32.mxu1 %vm2555_vm0, %v2553_v3 }
   0x2   :  { %50 = vst [vmem:[#allocation2 + $0x8] sm:$0xff] %v2553_v3  ;;  %51 = vst [vmem:[#allocation2 + $0x10] sm:$0x3] %v2553_v3  ;;  %v2242_v5 = vpack.c.bf16 %v1575_v1, %v1574_v0  ;;  %v1577_v6 = vld [vmem:[%s3151_s1 + $0x98] sm:$0xff]  ;;  %v1578_v8 = vld [vmem:[%s3151_s1 + $0xa0] sm:$0xff] }
   0x3   :  { %52 = vst [vmem:[#allocation2 + $0x18] sm:$0xff] %v2553_v3  ;;  %53 = vst [vmem:[#allocation2 + $0x20] sm:$0xff] %v2553_v3  ;;  %v2246_v7 = vpack.c.bf16 %v1577_v6, %v1576_v2  ;;  %v1579_v9 = vld [vmem:[%s3151_s1 + $0xa8] sm:$0xff]  ;;  %v55_v11 = vld [vmem:[%s3152_s0] sm:$0xff] }
   0x4   :  { %54 = vst [vmem:[#allocation2 + $0x28] sm:$0x3] %v2553_v3  ;;  %2243 = vmatprep.subr.bf16.mxu0 %v2242_v5  ;;  %v2250_v10 = vpack.c.bf16 %v1579_v9, %v1578_v8  ;;  %v1580_v12 = vld [vmem:[%s3151_s1 + $0xb0] sm:$0xff]  ;;  %v1581_v13 = vld [vmem:[%s3151_s1 + $0xb8] sm:$0xff]  ;;  %59 = vst [vmem:[#allocation2 + $0x1] sm:$0xff] %v55_v11  ;;  %1876 = vmatprep.mubr.f32.mxu0 %v55_v11 }
   0x5   :  { %2245 = vmatpush3.bf16.msra.mxu0 %v2242_v5  ;;  %v56_v14 = vld [vmem:[%s3152_s0 + $0x8] sm:$0xff]  ;;  %v2254_v15 = vpack.c.bf16 %v1581_v13, %v1580_v12  ;;  %v1582_v16 = vld [vmem:[%s3151_s1 + $0xc0] sm:$0xff]  ;;  %v2652_v18 = vld [vmem:[%s3152_s0 + $0x10] sm:$0xff] }
   0x6   :  { %2247 = vmatprep.subr.bf16.mxu0 %v2246_v7  ;;  %60 = vst [vmem:[#allocation2 + $0x9] sm:$0xff] %v56_v14  ;;  %v1583_v17 = vld [vmem:[%s3151_s1 + $0xc8] sm:$0xff]  ;;  %61 = vst [vmem:[#allocation2 + $0x19] sm:$0xff] %v2652_v18  ;;  %v2658_v19 = vld [vmem:[%s3152_s0 + $0x18] sm:$0xff] }
   0x7   :  { %62 = vst [vmem:[#allocation2 + $0x21] sm:$0xff] %v2658_v19  ;;  %v2258_v20 = vpack.c.bf16 %v1583_v17, %v1582_v16  ;;  %v1584_v21 = vld [vmem:[%s3151_s1 + $0xd0] sm:$0xff]  ;;  %v1585_v22 = vld [vmem:[%s3151_s1 + $0xd8] sm:$0xff]  ;;  %v1586_v24 = vld [vmem:[%s3151_s1 + $0xe0] sm:$0xff] }
   0x8   :  { %v2262_v23 = vpack.c.bf16 %v1585_v22, %v1584_v21  ;;  %v1587_v25 = vld [vmem:[%s3151_s1 + $0xe8] sm:$0xff]  ;;  %v32_v26 = vld [vmem:[%s3153_s7] sm:$0xff]  ;;  %v34_v28 = vld [vmem:[%s3153_s7 + $0x10] sm:$0xff] }
   0x9   :  { %2249 = vmatpush3.bf16.msra.mxu0 %v2246_v7  ;;  %v33_v27 = vld [vmem:[%s3153_s7 + $0x8] sm:$0xff]  ;;  %v2266_v29 = vpack.c.bf16 %v1587_v25, %v1586_v24  ;;  %v35_v31 = vld [vmem:[%s3153_s7 + $0x18] sm:$0xff]  ;;  %v1588_v32 = vld [vmem:[%s3151_s1 + $0xf0] sm:$0xff] }
   0xa   :  { %2251 = vmatprep.subr.bf16.mxu0 %v2250_v10  ;;  %v2682_v30 = vpack.c.bf16 %v33_v27, %v32_v26  ;;  %v1589_v33 = vld [vmem:[%s3151_s1 + $0xf8] sm:$0xff]  ;;  %v2694_v34 = vpack.c.bf16 %v35_v31, %v34_v28  ;;  %v36_v35 = vld [vmem:[%s3153_s7 + $0x20] sm:$0xff]  ;;  %v37_v36 = vld [vmem:[%s3153_s7 + $0x28] sm:$0xff] }
   0xb   :  { %v2270_v37 = vpack.c.bf16 %v1589_v33, %v1588_v32  ;;  %v69_v38 = vld [vmem:[%s3151_s1] sm:$0xff]  ;;  %v70_v39 = vld [vmem:[%s3151_s1 + $0x8] sm:$0xff]  ;;  %v2710_v40 = vpack.c.bf16 %v37_v36, %v36_v35  ;;  %v71_v42 = vld [vmem:[%s3151_s1 + $0x10] sm:$0xff] }
   0xc   :  { %2340 = vmatpush3.bf16.msra.mxu1 %v2682_v30  ;;  %v2274_v41 = vpack.c.bf16 %v70_v39, %v69_v38  ;;  %v72_v43 = vld [vmem:[%s3151_s1 + $0x18] sm:$0xff]  ;;  %v73_v45 = vld [vmem:[%s3151_s1 + $0x20] sm:$0xff]  ;;  %v74_v46 = vld [vmem:[%s3151_s1 + $0x28] sm:$0xff] }
   0xd   :  { %2253 = vmatpush3.bf16.msra.mxu0 %v2250_v10  ;;  %2341 = vmatprep.subr.bf16.mxu1 %v2554_v4  ;;  %v2278_v44 = vpack.c.bf16 %v72_v43, %v71_v42  ;;  %v2282_v47 = vpack.c.bf16 %v74_v46, %v73_v45  ;;  %v65_v48 = vld [vmem:[#allocation2] sm:$0xff]  ;;  %v75_v49 = vld [vmem:[%s3151_s1 + $0x30] sm:$0xff]  ;;  %v76_v50 = vld [vmem:[%s3151_s1 + $0x38] sm:$0xff] }
   0xe   :  { %2255 = vmatprep.subr.bf16.mxu0 %v2254_v15  ;;  %v2286_v51 = vpack.c.bf16 %v76_v50, %v75_v49  ;;  %v77_v52 = vld [vmem:[%s3151_s1 + $0x40] sm:$0xff]  ;;  %v78_v53 = vld [vmem:[%s3151_s1 + $0x48] sm:$0xff]  ;;  %v79_v55 = vld [vmem:[%s3151_s1 + $0x50] sm:$0xff] }
   0xf   :  { %v2290_v54 = vpack.c.bf16 %v78_v53, %v77_v52  ;;  %v80_v56 = vld [vmem:[%s3151_s1 + $0x58] sm:$0xff]  ;;  %v81_v58 = vld [vmem:[%s3151_s1 + $0x60] sm:$0xff]  ;;  %v82_v59 = vld [vmem:[%s3151_s1 + $0x68] sm:$0xff] }
  0x10   :  { %2343 = vmatpush3.bf16.msra.mxu1 %v2694_v34  ;;  %v2294_v57 = vpack.c.bf16 %v80_v56, %v79_v55  ;;  %v2298_v60 = vpack.c.bf16 %v82_v59, %v81_v58  ;;  %v83_v61 = vld [vmem:[%s3151_s1 + $0x70] sm:$0xff]  ;;  %v84_v62 = vld [vmem:[%s3151_s1 + $0x78] sm:$0xff]  ;;  %v1590_v0 = vld [vmem:[%s3151_s1 + $0x100] sm:$0xff] }
  0x11   :  { %2257 = vmatpush3.bf16.msra.mxu0 %v2254_v15  ;;  %2344 = vmatprep.subr.bf16.mxu1 %v2554_v4  ;;  %v2302_v63 = vpack.c.bf16 %v84_v62, %v83_v61  ;;  %v1591_v1 = vld [vmem:[%s3151_s1 + $0x108] sm:$0xff]  ;;  %v1592_v5 = vld [vmem:[%s3151_s1 + $0x110] sm:$0xff]  ;;  %v1593_v6 = vld [vmem:[%s3151_s1 + $0x118] sm:$0xff] }
  0x12   :  { %2259 = vmatprep.subr.bf16.mxu0 %v2258_v20  ;;  %v2306_v2 = vpack.c.bf16 %v1591_v1, %v1590_v0  ;;  %v66_v7 = vld [vmem:[#allocation2 + $0x8] sm:$0xff]  ;;  %v2310_v8 = vpack.c.bf16 %v1593_v6, %v1592_v5  ;;  %v67_v9 = vld [vmem:[#allocation2 + $0x18] sm:$0xff]  ;;  %v1594_v10 = vld [vmem:[%s3151_s1 + $0x120] sm:$0xff] }
  0x13   :  { %v1595_v11 = vld [vmem:[%s3151_s1 + $0x128] sm:$0xff]  ;;  %v68_v12 = vld [vmem:[#allocation2 + $0x20] sm:$0xff]  ;;  %v1596_v15 = vld [vmem:[%s3151_s1 + $0x130] sm:$0xff] }
  0x14   :  { %2346 = vmatpush3.bf16.msra.mxu1 %v2710_v40  ;;  %v2314_v13 = vpack.c.bf16 %v1595_v11, %v1594_v10  ;;  %v1597_v16 = vld [vmem:[%s3151_s1 + $0x138] sm:$0xff]  ;;  %v1599_v21 = vld [vmem:[%s3151_s1 + $0x148] sm:$0xff]  ;;  %v1602_v26 = vld [vmem:[%s3151_s1 + $0x160] sm:$0xff] }
  0x15   :  { %2261 = vmatpush3.bf16.msra.mxu0 %v2258_v20  ;;  %2347 = vmatprep.subr.bf16.mxu1 %v2554_v4  ;;  %v2318_v17 = vpack.c.bf16 %v1597_v16, %v1596_v15  ;;  %v1598_v20 = vld [vmem:[%s3151_s1 + $0x140] sm:$0xff]  ;;  %v1601_v24 = vld [vmem:[%s3151_s1 + $0x158] sm:$0xff]  ;;  %v1603_v27 = vld [vmem:[%s3151_s1 + $0x168] sm:$0xff] }
  0x16   :  { %2263 = vmatprep.subr.bf16.mxu0 %v2262_v23  ;;  %v2322_v22 = vpack.c.bf16 %v1599_v21, %v1598_v20  ;;  %v2330_v28 = vpack.c.bf16 %v1603_v27, %v1602_v26  ;;  %v1605_v31 = vld [vmem:[%s3151_s1 + $0x178] sm:$0xff]  ;;  %v277_v33 = vld [vmem:[#allocation2 + $0xa] sm:$0xff]  ;;  %v279_v36 = vld [vmem:[#allocation2 + $0x22] sm:$0xff] }
  0x17   :  { %v278_v35 = vld [vmem:[#allocation2 + $0x1a] sm:$0xff]  ;;  %v41_v42 = vld [vmem:[%s3153_s7 + $0x48] sm:$0xff]  ;;  %v46_v50 = vld [vmem:[%s3153_s7 + $0x70] sm:$0xff] }
  0x18   :  { %v39_v38 = vld [vmem:[%s3153_s7 + $0x38] sm:$0xff] }
  0x19   :  { %2265 = vmatpush3.bf16.msra.mxu0 %v2262_v23  ;;  %v1600_v23 = vld [vmem:[%s3151_s1 + $0x150] sm:$0xff]  ;;  %v43_v45 = vld [vmem:[%s3153_s7 + $0x58] sm:$0xff] }
  0x1a   :  { %2267 = vmatprep.subr.bf16.mxu0 %v2266_v29  ;;  %v2326_v25 = vpack.c.bf16 %v1601_v24, %v1600_v23 }
  0x1d   :  { %2269 = vmatpush3.bf16.msra.mxu0 %v2266_v29  ;;  %v1604_v29 = vld [vmem:[%s3151_s1 + $0x170] sm:$0xff] }
  0x1e   :  { %2271 = vmatprep.subr.bf16.mxu0 %v2270_v37  ;;  %v2334_v32 = vpack.c.bf16 %v1605_v31, %v1604_v29 }
  0x21   :  { %2273 = vmatpush3.bf16.msra.mxu0 %v2270_v37  ;;  %v38_v37 = vld [vmem:[%s3153_s7 + $0x30] sm:$0xff] }
  0x22   :  { %2275 = vmatprep.subr.bf16.mxu0 %v2274_v41  ;;  %v2820_v39 = vpack.c.bf16 %v39_v38, %v38_v37 }
  0x24   :  { %1877 = vmatmul.mubr.f32.vlgmr.msra.gmra.mrb[0].mxu0 %v56_v14  ;;  %v276_v14 = vld [vmem:[#allocation2 + $0x2] sm:$0xff]  ;;  %2349 = vmatpush3.bf16.msra.mxu1 %v2820_v39 }
  0x25   :  { %2277 = vmatpush3.bf16.msra.mxu0 %v2274_v41  ;;  %1879 = vmatprep.mubr.f32.mxu0 %v2652_v18  ;;  %v40_v41 = vld [vmem:[%s3153_s7 + $0x40] sm:$0xff] }
  0x26   :  { %2279 = vmatprep.subr.bf16.mxu0 %v2278_v44  ;;  %2350 = vmatprep.subr.bf16.mxu1 %v2554_v4  ;;  %v2832_v43 = vpack.c.bf16 %v41_v42, %v40_v41  ;;  %v63_v41 = vld [vmem:[%s3155_s3] sm:$0x1] }
  0x27   :  { %v1609_v42 = vld [vmem:[%s3156_s2 + $0x80] sm:$0xff] }
  0x28   :  { %1880 = vmatmul.mubr.f32.gmra.mrb[2].mxu0 %v2658_v19  ;;  %2352 = vmatpush3.bf16.msra.mxu1 %v2832_v43 }
  0x29   :  { %2281 = vmatpush3.bf16.msra.mxu0 %v2278_v44  ;;  %1914 = vmatprep.mubr.f32.mxu0 %v65_v48  ;;  %v42_v44 = vld [vmem:[%s3153_s7 + $0x50] sm:$0xff]  ;;  %v45_v48 = vld [vmem:[%s3153_s7 + $0x68] sm:$0xff] }
  0x2a   :  { %2283 = vmatprep.subr.bf16.mxu0 %v2282_v47  ;;  %2353 = vmatprep.subr.bf16.mxu1 %v2554_v4  ;;  %v2844_v46 = vpack.c.bf16 %v43_v45, %v42_v44  ;;  %v1610_v44 = vld [vmem:[%s3156_s2 + $0x88] sm:$0xff] }
  0x2c   :  { %2355 = vmatpush3.bf16.msra.mxu1 %v2844_v46 }
  0x2d   :  { %2285 = vmatpush3.bf16.msra.mxu0 %v2282_v47  ;;  %2356 = vmatprep.subr.bf16.mxu1 %v2554_v4  ;;  %v44_v47 = vld [vmem:[%s3153_s7 + $0x60] sm:$0xff] }
  0x2e   :  { %2287 = vmatprep.subr.bf16.mxu0 %v2286_v51  ;;  %v2856_v49 = vpack.c.bf16 %v45_v48, %v44_v47  ;;  %v2386_v48 = vpack.c.bf16 %v1610_v44, %v1609_v42 }
  0x30   :  { %2358 = vmatpush3.bf16.msra.mxu1 %v2856_v49 }
  0x31   :  { %2289 = vmatpush3.bf16.msra.mxu0 %v2286_v51  ;;  %v47_v51 = vld [vmem:[%s3153_s7 + $0x78] sm:$0xff]  ;;  %2359 = vmatprep.subr.bf16.mxu1 %v2554_v4 }
  0x32   :  { %2291 = vmatprep.subr.bf16.mxu0 %v2290_v54  ;;  %v2865_v52 = vpack.c.bf16 %v47_v51, %v46_v50  ;;  %v1611_v50 = vld [vmem:[%s3156_s2 + $0x90] sm:$0xff]  ;;  %v1612_v51 = vld [vmem:[%s3156_s2 + $0x98] sm:$0xff] }
  0x34   :  { %2361 = vmatpush3.bf16.msra.mxu1 %v2865_v52 }
  0x35   :  { %2293 = vmatpush3.bf16.msra.mxu0 %v2290_v54  ;;  %1993 = vmatprep.subr.mxu1 %v2553_v3 }
  0x36   :  { %2295 = vmatprep.subr.bf16.mxu0 %v2294_v57 }
  0x39   :  { %2297 = vmatpush3.bf16.msra.mxu0 %v2294_v57 }
  0x3a   :  { %2299 = vmatprep.subr.bf16.mxu0 %v2298_v60 }
  0x3d   :  { %2301 = vmatpush3.bf16.msra.mxu0 %v2298_v60 }
  0x3e   :  { %2303 = vmatprep.subr.bf16.mxu0 %v2302_v63 }
  0x41   :  { %2305 = vmatpush3.bf16.msra.mxu0 %v2302_v63 }
  0x42   :  { %2307 = vmatprep.subr.bf16.mxu0 %v2306_v2 }
  0x44   :  { %1915 = vmatmul.mubr.f32.vlgmr.msra.gmra.mrb[0].mxu0 %v66_v7 }
  0x45   :  { %2309 = vmatpush3.bf16.msra.mxu0 %v2306_v2  ;;  %1917 = vmatprep.mubr.f32.mxu0 %v67_v9  ;;  %v2881_v2 = vld [vmem:[%s3154_s8] sm:$0xff] }
  0x46   :  { %2311 = vmatprep.subr.bf16.mxu0 %v2310_v8 }
  0x48   :  { %1918 = vmatmul.mubr.f32.gmra.mrb[2].mxu0 %v68_v12 }
  0x49   :  { %2313 = vmatpush3.bf16.msra.mxu0 %v2310_v8  ;;  %1952 = vmatprep.mubr.f32.mxu0 %v276_v14  ;;  %v540_v8 = vlaneseq }
  0x4a   :  { %2315 = vmatprep.subr.bf16.mxu0 %v2314_v13 }
  0x4b   :  { %v541_v9 = vshrl.u32 %v540_v8, 7 }
  0x4d   :  { %2317 = vmatpush3.bf16.msra.mxu0 %v2314_v13  ;;  %v2906_v10 = vsub.s32 0, %v541_v9  ;;  %v1623_v9 = vld [vmem:[%s3156_s2 + $0xf0] sm:$0xff] }
  0x4e   :  { %2319 = vmatprep.subr.bf16.mxu0 %v2318_v17 }
  0x51   :  { %2321 = vmatpush3.bf16.msra.mxu0 %v2318_v17 }
  0x52   :  { %2323 = vmatprep.subr.bf16.mxu0 %v2322_v22 }
  0x55   :  { %2325 = vmatpush3.bf16.msra.mxu0 %v2322_v22 }
  0x56   :  { %2327 = vmatprep.subr.bf16.mxu0 %v2326_v25 }
  0x59   :  { %2329 = vmatpush3.bf16.msra.mxu0 %v2326_v25 }
  0x5a   :  { %2331 = vmatprep.subr.bf16.mxu0 %v2330_v28 }
  0x5d   :  { %2333 = vmatpush3.bf16.msra.mxu0 %v2330_v28 }
  0x5e   :  { %2335 = vmatprep.subr.bf16.mxu0 %v2334_v32 }
  0x61   :  { %2337 = vmatpush3.bf16.msra.mxu0 %v2334_v32 }
  0x62   :  { %2482 = vmatprep.subr.bf16.mxu0 %v2554_v4 }
  0x64   :  { %1953 = vmatmul.mubr.f32.vlgmr.msra.gmra.mrb[0].mxu0 %v277_v33 }
  0x65   :  { %1955 = vmatprep.mubr.f32.mxu0 %v278_v35  ;;  %2484 = vmatpush3.bf16.msra.mxu0 %v2682_v30 }
  0x66   :  { %2485 = vmatprep.subr.bf16.mxu0 %v2554_v4 }
  0x68   :  { %1956 = vmatmul.mubr.f32.gmra.mrb[2].mxu0 %v279_v36 }
  0x69   :  { %2487 = vmatpush3.bf16.msra.mxu0 %v2694_v34  ;;  %2189 = vmatprep.mubr.msk.f32.mxu0 %vm2555_vm0, %v2553_v3 }
  0x6a   :  { %2488 = vmatprep.subr.bf16.mxu0 %v2554_v4 }
  0x6d   :  { %2490 = vmatpush3.bf16.msra.mxu0 %v2710_v40 }
  0x6e   :  { %2491 = vmatprep.subr.bf16.mxu0 %v2554_v4 }
  0x71   :  { %2493 = vmatpush3.bf16.msra.mxu0 %v2820_v39 }
  0x72   :  { %2494 = vmatprep.subr.bf16.mxu0 %v2554_v4 }
  0x75   :  { %2496 = vmatpush3.bf16.msra.mxu0 %v2832_v43 }
  0x76   :  { %2497 = vmatprep.subr.bf16.mxu0 %v2554_v4 }
  0x79   :  { %2499 = vmatpush3.bf16.msra.mxu0 %v2844_v46 }
  0x7a   :  { %2500 = vmatprep.subr.bf16.mxu0 %v2554_v4 }
  0x7d   :  { %2502 = vmatpush3.bf16.msra.mxu0 %v2856_v49 }
  0x7e   :  { %2503 = vmatprep.subr.bf16.mxu0 %v2554_v4 }
  0x81   :  { %2505 = vmatpush3.bf16.msra.mxu0 %v2865_v52 }
  0x82   :  { %2192 = vmatprep.subr.mxu0 %v2553_v3 }
 0x137   :  { %v1954_v53 = vpop.f32.mrb[0].mxu0 }
 0x138   :  { %v363_v54 = vpop.f32.mrb[1].mxu0 }
 0x139   :  { %v386_v55 = vadd.f32 %v1954_v53, %v363_v54 }
 0x13b   :  { %v1957_v56 = vpop.f32.mrb[2].mxu0 }
 0x13c   :  { %v373_v57 = vpop.f32.mrb[3].mxu0 }
 0x13d   :  { %v387_v58 = vadd.f32 %v386_v55, %v373_v57  ;;  %v1613_v55 = vld [vmem:[%s3156_s2 + $0xa0] sm:$0xff] }
 0x13f   :  { %v388_v59 = vadd.f32 %v1957_v56, %v387_v58  ;;  %v1615_v58 = vld [vmem:[%s3156_s2 + $0xb0] sm:$0xff] }
 0x141   :  { %v389_v60 = vrot.slane %v388_v59, 4 }
 0x143   :  { %v390_v61 = vadd.f32 %v389_v60, %v388_v59  ;;  %v1616_v59 = vld [vmem:[%s3156_s2 + $0xb8] sm:$0xff] }
 0x144   :  { %v2398_v60 = vpack.c.bf16 %v1616_v59, %v1615_v58  ;;  %v827_v58 = vld [vmem:[%s3156_s2 + $0x40] sm:$0xff]  ;;  %v828_v59 = vld [vmem:[%s3156_s2 + $0x48] sm:$0xff] }
 0x145   :  { %v391_v62 = vrot.slane %v390_v61, 2 }
 0x147   :  { %v392_v63 = vadd.f32 %v391_v62, %v390_v61  ;;  %v1617_v61 = vld [vmem:[%s3156_s2 + $0xc0] sm:$0xff]  ;;  %v1618_v62 = vld [vmem:[%s3156_s2 + $0xc8] sm:$0xff] }
 0x149   :  { %v393_v0 = vrot.slane %v392_v63, 1 }
 0x14b   :  { %v394_v1 = vadd.f32 %v393_v0, %v392_v63  ;;  %v2402_v63 = vpack.c.bf16 %v1618_v62, %v1617_v61  ;;  %v1619_v0 = vld [vmem:[%s3156_s2 + $0xd0] sm:$0xff]  ;;  %v830_v62 = vld [vmem:[%s3156_s2 + $0x58] sm:$0xff] }
 0x14c   :  { %v829_v61 = vld [vmem:[%s3156_s2 + $0x50] sm:$0xff] }
 0x14d   :  { %1991 = vmatmul.mubr.f32.vlgmr.msra.gmra.mrb[0].mxu1 %v394_v1  ;;  %v1620_v1 = vld [vmem:[%s3156_s2 + $0xd8] sm:$0xff] }
 0x14e   :  { %1994 = vmatpush3.msra.mxu1 %v2881_v2  ;;  %1995 = vmatprep.mubr.msk.f32.mxu1 %vm2555_vm0, %v2553_v3 }
 0x14f   :  { %2362 = vmatprep.subr.bf16.mxu1 %v2554_v4 }
 0x220   :  { %v461_v5 = vpop.f32.mrb[0].mxu1 }
 0x221   :  { %v465_v6 = vmul.f32 0.001953125, %v461_v5  ;;  %v1992_v7 = vpop.f32.mrb[1].mxu1  ;;  %v2406_v5 = vpack.c.bf16 %v1620_v1, %v1619_v0  ;;  %v831_v0 = vld [vmem:[%s3156_s2 + $0x60] sm:$0xff]  ;;  %v832_v1 = vld [vmem:[%s3156_s2 + $0x68] sm:$0xff] }
 0x222   :  { %v1622_v7 = vld [vmem:[%s3156_s2 + $0xe8] sm:$0xff] }
 0x223   :  { %1996 = vmatmul.mubr.msk.f32.vlgmr.msra.gmra.mrb[2].mxu1 %vm466_vm1, %v465_v6  ;;  %v1621_v6 = vld [vmem:[%s3156_s2 + $0xe0] sm:$0xff] }
 0x224   :  { %2364 = vmatpush3.bf16.msra.mxu1 %v2682_v30  ;;  %2030 = vmatprep.mubr.msk.f32.mxu1 %vm2555_vm0, %v2553_v3  ;;  %v2410_v8 = vpack.c.bf16 %v1622_v7, %v1621_v6  ;;  %v833_v6 = vld [vmem:[%s3156_s2 + $0x70] sm:$0xff]  ;;  %v834_v7 = vld [vmem:[%s3156_s2 + $0x78] sm:$0xff] }
 0x225   :  { %2365 = vmatprep.subr.bf16.mxu1 %v2554_v4 }
 0x228   :  { %2367 = vmatpush3.bf16.msra.mxu1 %v2694_v34 }
 0x229   :  { %2368 = vmatprep.subr.bf16.mxu1 %v2554_v4 }
 0x22c   :  { %2370 = vmatpush3.bf16.msra.mxu1 %v2710_v40 }
 0x22d   :  { %2371 = vmatprep.subr.bf16.mxu1 %v2554_v4 }
 0x230   :  { %2373 = vmatpush3.bf16.msra.mxu1 %v2820_v39 }
 0x231   :  { %2374 = vmatprep.subr.bf16.mxu1 %v2554_v4 }
 0x234   :  { %2376 = vmatpush3.bf16.msra.mxu1 %v2832_v43 }
 0x235   :  { %2377 = vmatprep.subr.bf16.mxu1 %v2554_v4 }
 0x238   :  { %2379 = vmatpush3.bf16.msra.mxu1 %v2844_v46 }
 0x239   :  { %2380 = vmatprep.subr.bf16.mxu1 %v2554_v4 }
 0x23c   :  { %2382 = vmatpush3.bf16.msra.mxu1 %v2856_v49 }
 0x23d   :  { %2383 = vmatprep.subr.bf16.mxu1 %v2554_v4 }
 0x240   :  { %2385 = vmatpush3.bf16.msra.mxu1 %v2865_v52 }
 0x241   :  { %2033 = vmatprep.subr.mxu1 %v2553_v3 }
 0x2f6   :  { %v536_v11 = vpop.f32.mrb[2].mxu1 }
 0x2f7   :  { %v543_v12 = vrot.slane %v536_v11, %v2906_v10  ;;  %v1997_v13 = vpop.f32.mrb[3].mxu1  ;;  %v1624_v11 = vld [vmem:[%s3156_s2 + $0xf8] sm:$0xff] }
 0x2f8   :  { %v819_v13 = vld [vmem:[%s3156_s2] sm:$0xff] }
 0x2f9   :  { %v2909_v14 = vsub.f32 %v363_v54, %v543_v12  ;;  %v2911_v15 = vsub.f32 %v1954_v53, %v543_v12  ;;  %v2913_v16 = vsub.f32 %v373_v57, %v543_v12  ;;  %v2915_v17 = vsub.f32 %v1957_v56, %v543_v12  ;;  %v64_v53 = vld [vmem:[%s3157_s4] sm:$0x1]  ;;  %v1614_v56 = vld [vmem:[%s3156_s2 + $0xa8] sm:$0xff] }
 0x2fa   :  { %v2390_v54 = vpack.c.bf16 %v1612_v51, %v1611_v50  ;;  %v2394_v57 = vpack.c.bf16 %v1614_v56, %v1613_v55  ;;  %v2414_v12 = vpack.c.bf16 %v1624_v11, %v1623_v9  ;;  %v823_v50 = vld [vmem:[%s3156_s2 + $0x20] sm:$0xff]  ;;  %v824_v51 = vld [vmem:[%s3156_s2 + $0x28] sm:$0xff]  ;;  %v826_v55 = vld [vmem:[%s3156_s2 + $0x38] sm:$0xff] }
 0x2fb   :  { %v548_v20 = vmul.f32 %v2909_v14, %v2909_v14  ;;  %v549_v21 = vmul.f32 %v2911_v15, %v2911_v15  ;;  %v550_v22 = vmul.f32 %v2913_v16, %v2913_v16  ;;  %v551_v24 = vmul.f32 %v2915_v17, %v2915_v17  ;;  %v1625_v9 = vld [vmem:[%s3156_s2 + $0x100] sm:$0xff]  ;;  %v1626_v11 = vld [vmem:[%s3156_s2 + $0x108] sm:$0xff] }
 0x2fd   :  { %v552_v23 = vadd.f32 %v549_v21, %v548_v20  ;;  %v820_v20 = vld [vmem:[%s3156_s2 + $0x8] sm:$0xff] }
 0x2fe   :  { %v2418_v21 = vpack.c.bf16 %v820_v20, %v819_v13  ;;  %v1627_v13 = vld [vmem:[%s3156_s2 + $0x110] sm:$0xff]  ;;  %v1628_v20 = vld [vmem:[%s3156_s2 + $0x118] sm:$0xff] }
 0x2ff   :  { %v553_v25 = vadd.f32 %v552_v23, %v550_v22 }
 0x301   :  { %v554_v26 = vadd.f32 %v553_v25, %v551_v24 }
 0x303   :  { %v555_v27 = vrot.slane %v554_v26, 4 }
 0x305   :  { %v556_v28 = vadd.f32 %v555_v27, %v554_v26 }
 0x307   :  { %v557_v29 = vrot.slane %v556_v28, 2 }
 0x309   :  { %v558_v31 = vadd.f32 %v557_v29, %v556_v28 }
 0x30b   :  { %v559_v32 = vrot.slane %v558_v31, 1 }
 0x30d   :  { %v560_v33 = vadd.f32 %v559_v32, %v558_v31 }
 0x30f   :  { %2031 = vmatmul.mubr.f32.vlgmr.msra.gmra.mrb[4].mxu1 %v560_v33 }
 0x310   :  { %2034 = vmatpush3.msra.mxu1 %v2881_v2  ;;  %2035 = vmatprep.mubr.msk.f32.mxu1 %vm2555_vm0, %v2553_v3 }
 0x311   :  { %2038 = vmatprep.subr.mxu1 %v2553_v3 }
 0x3e2   :  { %v627_v35 = vpop.f32.mrb[4].mxu1 }
 0x3e3   :  { %v631_v36 = vmul.f32 0.001953125, %v627_v35  ;;  %v2032_v37 = vpop.f32.mrb[5].mxu1 }
 0x3e5   :  { %v632_v38 = vadd.f32 1e-05, %v631_v36 }
 0x3e7   :  { %2549 = vrsqrt.f32 %v632_v38 }
 0x3f1   :  { %v2550_v45 = vpop.eup %2549 }
 0x3f2   :  { %v634_v47 = vmul.f32 %v2550_v45, %v63_v41 }
 0x3f4   :  { %2036 = vmatmul.mubr.msk.f32.vlgmr.msra.gmra.mrb[6].mxu1 %vm466_vm1, %v634_v47 }
 0x3f5   :  { %2039 = vmatpush3.msra.mxu1 %v2881_v2  ;;  %2040 = vmatprep.mubr.msk.f32.mxu1 %vm2555_vm0, %v2553_v3 }
 0x3f6   :  { %2387 = vmatprep.subr.bf16.mxu1 %v2386_v48 }
 0x3f8   :  { %2041 = vmatmul.mubr.msk.f32.vlgmr.msra.gmra.mrb[8].mxu1 %vm466_vm1, %v64_v53  ;;  %v2426_v53 = vpack.c.bf16 %v824_v51, %v823_v50 }
 0x3f9   :  { %2389 = vmatpush3.bf16.msra.mxu1 %v2386_v48 }
 0x3fa   :  { %2391 = vmatprep.subr.bf16.mxu1 %v2390_v54 }
 0x3fd   :  { %2393 = vmatpush3.bf16.msra.mxu1 %v2390_v54  ;;  %v825_v54 = vld [vmem:[%s3156_s2 + $0x30] sm:$0xff] }
 0x3fe   :  { %2395 = vmatprep.subr.bf16.mxu1 %v2394_v57 }
 0x401   :  { %2397 = vmatpush3.bf16.msra.mxu1 %v2394_v57  ;;  %v2430_v57 = vpack.c.bf16 %v826_v55, %v825_v54 }
 0x402   :  { %2399 = vmatprep.subr.bf16.mxu1 %v2398_v60 }
 0x405   :  { %2401 = vmatpush3.bf16.msra.mxu1 %v2398_v60  ;;  %v2434_v60 = vpack.c.bf16 %v828_v59, %v827_v58 }
 0x406   :  { %2403 = vmatprep.subr.bf16.mxu1 %v2402_v63 }
 0x409   :  { %2405 = vmatpush3.bf16.msra.mxu1 %v2402_v63  ;;  %v2438_v63 = vpack.c.bf16 %v830_v62, %v829_v61 }
 0x40a   :  { %2407 = vmatprep.subr.bf16.mxu1 %v2406_v5 }
 0x40d   :  { %2409 = vmatpush3.bf16.msra.mxu1 %v2406_v5  ;;  %v2442_v5 = vpack.c.bf16 %v832_v1, %v831_v0 }
 0x40e   :  { %2411 = vmatprep.subr.bf16.mxu1 %v2410_v8 }
 0x411   :  { %2413 = vmatpush3.bf16.msra.mxu1 %v2410_v8  ;;  %v2446_v8 = vpack.c.bf16 %v834_v7, %v833_v6 }
 0x412   :  { %2415 = vmatprep.subr.bf16.mxu1 %v2414_v12 }
 0x415   :  { %2417 = vmatpush3.bf16.msra.mxu1 %v2414_v12  ;;  %v2450_v12 = vpack.c.bf16 %v1626_v11, %v1625_v9 }
 0x416   :  { %2419 = vmatprep.subr.bf16.mxu1 %v2418_v21 }
 0x4c7   :  { %v704_v22 = vpop.f32.mrb[6].mxu1 }
 0x4c8   :  { %v784_v23 = vrot.slane %v704_v22, %v2906_v10  ;;  %v2037_v24 = vpop.f32.mrb[7].mxu1 }
 0x4c9   :  { %v1630_v24 = vld [vmem:[%s3156_s2 + $0x128] sm:$0xff] }
 0x4ca   :  { %v785_v25 = vmul.f32 %v784_v23, %v2909_v14  ;;  %v786_v27 = vmul.f32 %v784_v23, %v2911_v15  ;;  %v787_v28 = vmul.f32 %v784_v23, %v2913_v16  ;;  %v788_v29 = vmul.f32 %v784_v23, %v2915_v17  ;;  %v821_v14 = vld [vmem:[%s3156_s2 + $0x10] sm:$0xff]  ;;  %v822_v15 = vld [vmem:[%s3156_s2 + $0x18] sm:$0xff]  ;;  %v1629_v23 = vld [vmem:[%s3156_s2 + $0x120] sm:$0xff] }
 0x4cb   :  { %v777_v26 = vpop.f32.mrb[8].mxu1  ;;  %v2422_v47 = vpack.c.bf16 %v822_v15, %v821_v14  ;;  %v1636_v14 = vld [vmem:[%s3156_s2 + $0x158] sm:$0xff] }
 0x4cc   :  { %v792_v31 = vrot.slane %v777_v26, %v2906_v10  ;;  %v2042_v32 = vpop.f32.mrb[9].mxu1  ;;  %v2458_v26 = vpack.c.bf16 %v1630_v24, %v1629_v23 }
 0x4ce   :  { %v793_v33 = vadd.f32 %v792_v31, %v785_v25  ;;  %v794_v35 = vadd.f32 %v792_v31, %v786_v27  ;;  %v795_v36 = vadd.f32 %v792_v31, %v787_v28  ;;  %v796_v37 = vadd.f32 %v792_v31, %v788_v29  ;;  %v1631_v28 = vld [vmem:[%s3156_s2 + $0x130] sm:$0xff]  ;;  %v1632_v29 = vld [vmem:[%s3156_s2 + $0x138] sm:$0xff] }
 0x4cf   :  { %v2462_v32 = vpack.c.bf16 %v1632_v29, %v1631_v28  ;;  %v813_v28 = vld [vmem:[%s3158_s5] sm:$0x1] }
 0x4d0   :  { %vm797_vm2 = vcmp.gt.f32.partialorder %v793_v33, 0.0  ;;  %vm798_vm3 = vcmp.gt.f32.partialorder %v794_v35, 0.0  ;;  %vm799_vm4 = vcmp.gt.f32.partialorder %v795_v36, 0.0  ;;  %vm800_vm5 = vcmp.gt.f32.partialorder %v796_v37, 0.0 }
 0x4d1   :  { %v801_v16 = vmul.f32 0.2, %v793_v33  ;;  %v802_v17 = vmul.f32 0.2, %v794_v35  ;;  %v803_v38 = vmul.f32 0.2, %v795_v36 }
 0x4d2   :  { %v804_v41 = vmul.f32 0.2, %v796_v37 }
 0x4d3   :  { %v805_v42 = vsel %vm797_vm2, %v793_v33, %v801_v16  ;;  %v806_v44 = vsel %vm798_vm3, %v794_v35, %v802_v17  ;;  %v807_v45 = vsel %vm799_vm4, %v795_v36, %v803_v38  ;;  %v1633_v33 = vld [vmem:[%s3156_s2 + $0x140] sm:$0xff]  ;;  %v1634_v35 = vld [vmem:[%s3156_s2 + $0x148] sm:$0xff] }
 0x4d4   :  { %v808_v48 = vsel %vm800_vm5, %v796_v37, %v804_v41  ;;  %809 = vst [vmem:[#allocation2 + $0x1] sm:$0xff] %v805_v42  ;;  %810 = vst [vmem:[#allocation2 + $0x9] sm:$0xff] %v806_v44  ;;  %2075 = vmatprep.mubr.f32.mxu1 %v805_v42  ;;  %v2466_v36 = vpack.c.bf16 %v1634_v35, %v1633_v33  ;;  %v1635_v37 = vld [vmem:[%s3156_s2 + $0x150] sm:$0xff]  ;;  %v1637_v16 = vld [vmem:[%s3156_s2 + $0x160] sm:$0xff] }
 0x4d5   :  { %811 = vst [vmem:[#allocation2 + $0x19] sm:$0xff] %v807_v45  ;;  %812 = vst [vmem:[#allocation2 + $0x21] sm:$0xff] %v808_v48  ;;  %2076 = vmatmul.mubr.f32.vlgmr.msra.gmra.mrb[10].mxu1 %v806_v44  ;;  %v2470_v15 = vpack.c.bf16 %v1636_v14, %v1635_v37  ;;  %v1638_v17 = vld [vmem:[%s3156_s2 + $0x168] sm:$0xff]  ;;  %v1639_v41 = vld [vmem:[%s3156_s2 + $0x170] sm:$0xff] }
 0x4d6   :  { %2421 = vmatpush3.bf16.msra.mxu1 %v2418_v21  ;;  %2078 = vmatprep.mubr.f32.mxu1 %v807_v45  ;;  %v2454_v21 = vpack.c.bf16 %v1628_v20, %v1627_v13  ;;  %v2474_v38 = vpack.c.bf16 %v1638_v17, %v1637_v16  ;;  %v1640_v42 = vld [vmem:[%s3156_s2 + $0x178] sm:$0xff] }
 0x4d7   :  { %2423 = vmatprep.subr.bf16.mxu1 %v2422_v47  ;;  %v2478_v44 = vpack.c.bf16 %v1640_v42, %v1639_v41  ;;  %v1547_v41 = vld [vmem:[%s3152_s0 + $0x8] sm:$0xff] }
 0x4d9   :  { %2079 = vmatmul.mubr.f32.gmra.mrb[12].mxu1 %v808_v48 }
 0x4da   :  { %2425 = vmatpush3.bf16.msra.mxu1 %v2422_v47 }
 0x4db   :  { %v815_v56 = vld [vmem:[#allocation2] sm:$0xff]  ;;  %2427 = vmatprep.subr.bf16.mxu1 %v2426_v53  ;;  %v816_v22 = vld [vmem:[#allocation2 + $0x8] sm:$0xff] }
 0x4dc   :  { %2113 = vmatprep.mubr.f32.mxu1 %v815_v56  ;;  %v817_v25 = vld [vmem:[#allocation2 + $0x18] sm:$0xff]  ;;  %v818_v27 = vld [vmem:[#allocation2 + $0x20] sm:$0xff]  ;;  %v1027_v45 = vld [vmem:[#allocation2 + $0xa] sm:$0xff] }
 0x4dd   :  { %v1026_v31 = vld [vmem:[#allocation2 + $0x2] sm:$0xff]  ;;  %v1028_v47 = vld [vmem:[#allocation2 + $0x1a] sm:$0xff] }
 0x4de   :  { %2429 = vmatpush3.bf16.msra.mxu1 %v2426_v53  ;;  %v1029_v48 = vld [vmem:[#allocation2 + $0x22] sm:$0xff] }
 0x4df   :  { %2431 = vmatprep.subr.bf16.mxu1 %v2430_v57 }
 0x4e2   :  { %2433 = vmatpush3.bf16.msra.mxu1 %v2430_v57 }
 0x4e3   :  { %2435 = vmatprep.subr.bf16.mxu1 %v2434_v60 }
 0x4e6   :  { %2437 = vmatpush3.bf16.msra.mxu1 %v2434_v60 }
 0x4e7   :  { %2439 = vmatprep.subr.bf16.mxu1 %v2438_v63 }
 0x4ea   :  { %2441 = vmatpush3.bf16.msra.mxu1 %v2438_v63 }
 0x4eb   :  { %2443 = vmatprep.subr.bf16.mxu1 %v2442_v5 }
 0x4ee   :  { %2445 = vmatpush3.bf16.msra.mxu1 %v2442_v5 }
 0x4ef   :  { %2447 = vmatprep.subr.bf16.mxu1 %v2446_v8 }
 0x4f2   :  { %2449 = vmatpush3.bf16.msra.mxu1 %v2446_v8 }
 0x4f3   :  { %2451 = vmatprep.subr.bf16.mxu1 %v2450_v12 }
 0x4f5   :  { %2114 = vmatmul.mubr.f32.vlgmr.msra.gmra.mrb[10].mxu1 %v816_v22 }
 0x4f6   :  { %2116 = vmatprep.mubr.f32.mxu1 %v817_v25  ;;  %2453 = vmatpush3.bf16.msra.mxu1 %v2450_v12 }
 0x4f7   :  { %2455 = vmatprep.subr.bf16.mxu1 %v2454_v21 }
 0x4f9   :  { %2117 = vmatmul.mubr.f32.gmra.mrb[12].mxu1 %v818_v27 }
 0x4fa   :  { %2457 = vmatpush3.bf16.msra.mxu1 %v2454_v21  ;;  %2151 = vmatprep.mubr.f32.mxu1 %v1026_v31 }
 0x4fb   :  { %2459 = vmatprep.subr.bf16.mxu1 %v2458_v26 }
 0x4fe   :  { %2461 = vmatpush3.bf16.msra.mxu1 %v2458_v26 }
 0x4ff   :  { %2463 = vmatprep.subr.bf16.mxu1 %v2462_v32 }
 0x502   :  { %2465 = vmatpush3.bf16.msra.mxu1 %v2462_v32  ;;  %v814_v32 = vld [vmem:[%s3159_s6] sm:$0x1] }
 0x503   :  { %2467 = vmatprep.subr.bf16.mxu1 %v2466_v36 }
 0x506   :  { %2469 = vmatpush3.bf16.msra.mxu1 %v2466_v36 }
 0x507   :  { %2471 = vmatprep.subr.bf16.mxu1 %v2470_v15 }
 0x50a   :  { %2473 = vmatpush3.bf16.msra.mxu1 %v2470_v15 }
 0x50b   :  { %2475 = vmatprep.subr.bf16.mxu1 %v2474_v38 }
 0x50e   :  { %2477 = vmatpush3.bf16.msra.mxu1 %v2474_v38 }
 0x50f   :  { %2479 = vmatprep.subr.bf16.mxu1 %v2478_v44 }
 0x512   :  { %2481 = vmatpush3.bf16.msra.mxu1 %v2478_v44 }
 0x515   :  { %2152 = vmatmul.mubr.f32.vlgmr.msra.gmra.mrb[10].mxu1 %v1027_v45 }
 0x516   :  { %2154 = vmatprep.mubr.f32.mxu1 %v1028_v47 }
 0x519   :  { %2155 = vmatmul.mubr.f32.gmra.mrb[12].mxu1 %v1029_v48 }
 0x5e8   :  { %v2153_v50 = vpop.f32.mrb[10].mxu1 }
 0x5e9   :  { %v1113_v51 = vpop.f32.mrb[11].mxu1 }
 0x5ea   :  { %v1136_v53 = vadd.f32 %v2153_v50, %v1113_v51 }
 0x5ec   :  { %v2156_v54 = vpop.f32.mrb[12].mxu1 }
 0x5ed   :  { %v1123_v55 = vpop.f32.mrb[13].mxu1 }
 0x5ee   :  { %v1137_v56 = vadd.f32 %v1136_v53, %v1123_v55 }
 0x5f0   :  { %v1138_v57 = vadd.f32 %v2156_v54, %v1137_v56 }
 0x5f2   :  { %v1139_v58 = vrot.slane %v1138_v57, 4 }
 0x5f4   :  { %v1140_v59 = vadd.f32 %v1139_v58, %v1138_v57 }
 0x5f6   :  { %v1141_v60 = vrot.slane %v1140_v59, 2 }
 0x5f8   :  { %v1142_v61 = vadd.f32 %v1141_v60, %v1140_v59 }
 0x5fa   :  { %v1143_v62 = vrot.slane %v1142_v61, 1 }
 0x5fc   :  { %v1144_v63 = vadd.f32 %v1143_v62, %v1142_v61 }
 0x5fe   :  { %2190 = vmatmul.mubr.f32.vlgmr.msra.gmra.mrb[4].mxu0 %v1144_v63 }
 0x5ff   :  { %2193 = vmatpush3.msra.mxu0 %v2881_v2  ;;  %2194 = vmatprep.mubr.msk.f32.mxu0 %vm2555_vm0, %v2553_v3 }
 0x600   :  { %2506 = vmatprep.subr.bf16.mxu0 %v2554_v4 }
 0x6d1   :  { %v1211_v0 = vpop.f32.mrb[4].mxu0 }
 0x6d2   :  { %v1215_v1 = vmul.f32 0.001953125, %v1211_v0  ;;  %v2191_v5 = vpop.f32.mrb[5].mxu0 }
 0x6d4   :  { %2195 = vmatmul.mubr.msk.f32.vlgmr.msra.gmra.mrb[6].mxu0 %vm466_vm1, %v1215_v1 }
 0x6d5   :  { %2508 = vmatpush3.bf16.msra.mxu0 %v2682_v30  ;;  %2229 = vmatprep.mubr.msk.f32.mxu0 %vm2555_vm0, %v2553_v3 }
 0x6d6   :  { %2509 = vmatprep.subr.bf16.mxu0 %v2554_v4 }
 0x6d9   :  { %2511 = vmatpush3.bf16.msra.mxu0 %v2694_v34 }
 0x6da   :  { %2512 = vmatprep.subr.bf16.mxu0 %v2554_v4 }
 0x6dd   :  { %2514 = vmatpush3.bf16.msra.mxu0 %v2710_v40 }
 0x6de   :  { %2515 = vmatprep.subr.bf16.mxu0 %v2554_v4 }
 0x6e1   :  { %2517 = vmatpush3.bf16.msra.mxu0 %v2820_v39 }
 0x6e2   :  { %2518 = vmatprep.subr.bf16.mxu0 %v2554_v4 }
 0x6e5   :  { %2520 = vmatpush3.bf16.msra.mxu0 %v2832_v43 }
 0x6e6   :  { %2521 = vmatprep.subr.bf16.mxu0 %v2554_v4 }
 0x6e9   :  { %2523 = vmatpush3.bf16.msra.mxu0 %v2844_v46 }
 0x6ea   :  { %2524 = vmatprep.subr.bf16.mxu0 %v2554_v4 }
 0x6ed   :  { %2526 = vmatpush3.bf16.msra.mxu0 %v2856_v49 }
 0x6ee   :  { %2527 = vmatprep.subr.bf16.mxu0 %v2554_v4 }
 0x6f1   :  { %2529 = vmatpush3.bf16.msra.mxu0 %v2865_v52 }
 0x6f2   :  { %2232 = vmatprep.subr.mxu0 %v2553_v3 }
 0x7a7   :  { %v1285_v30 = vpop.f32.mrb[6].mxu0 }
 0x7a8   :  { %v1292_v34 = vrot.slane %v1285_v30, %v2906_v10  ;;  %v2196_v40 = vpop.f32.mrb[7].mxu0 }
 0x7aa   :  { %v1293_v39 = vsub.f32 %v1113_v51, %v1292_v34  ;;  %v1294_v43 = vsub.f32 %v2153_v50, %v1292_v34  ;;  %v1295_v6 = vsub.f32 %v1123_v55, %v1292_v34  ;;  %v1296_v7 = vsub.f32 %v2156_v54, %v1292_v34 }
 0x7ac   :  { %v1297_v8 = vmul.f32 %v1293_v39, %v1293_v39  ;;  %v1298_v46 = vmul.f32 %v1294_v43, %v1294_v43  ;;  %v1299_v9 = vmul.f32 %v1295_v6, %v1295_v6  ;;  %v1300_v12 = vmul.f32 %v1296_v7, %v1296_v7 }
 0x7ae   :  { %v1301_v11 = vadd.f32 %v1298_v46, %v1297_v8 }
 0x7b0   :  { %v1302_v49 = vadd.f32 %v1301_v11, %v1299_v9 }
 0x7b2   :  { %v1303_v13 = vadd.f32 %v1302_v49, %v1300_v12 }
 0x7b4   :  { %v1304_v4 = vrot.slane %v1303_v13, 4 }
 0x7b6   :  { %v1305_v20 = vadd.f32 %v1304_v4, %v1303_v13 }
 0x7b8   :  { %v1306_v52 = vrot.slane %v1305_v20, 2 }
 0x7ba   :  { %v1307_v21 = vadd.f32 %v1306_v52, %v1305_v20 }
 0x7bc   :  { %v1308_v22 = vrot.slane %v1307_v21, 1 }
 0x7be   :  { %v1309_v23 = vadd.f32 %v1308_v22, %v1307_v21 }
 0x7c0   :  { %2230 = vmatmul.mubr.f32.vlgmr.msra.gmra.mrb[8].mxu0 %v1309_v23 }
 0x7c1   :  { %2233 = vmatpush3.msra.mxu0 %v2881_v2  ;;  %2234 = vmatprep.mubr.msk.f32.mxu0 %vm2555_vm0, %v2553_v3 }
 0x7c2   :  { %2237 = vmatprep.subr.mxu0 %v2553_v3 }
 0x893   :  { %v1376_v24 = vpop.f32.mrb[8].mxu0 }
 0x894   :  { %v1380_v25 = vmul.f32 0.001953125, %v1376_v24  ;;  %v2231_v26 = vpop.f32.mrb[9].mxu0 }
 0x896   :  { %v1381_v27 = vadd.f32 1e-05, %v1380_v25 }
 0x898   :  { %2551 = vrsqrt.f32 %v1381_v27 }
 0x8a2   :  { %v2552_v29 = vpop.eup %2551 }
 0x8a3   :  { %v1383_v31 = vmul.f32 %v2552_v29, %v813_v28 }
 0x8a5   :  { %2235 = vmatmul.mubr.msk.f32.vlgmr.msra.gmra.mrb[10].mxu0 %vm466_vm1, %v1383_v31 }
 0x8a6   :  { %2238 = vmatpush3.msra.mxu0 %v2881_v2  ;;  %2239 = vmatprep.mubr.msk.f32.mxu0 %vm2555_vm0, %v2553_v3  ;;  %v1546_v3 = vld [vmem:[%s3152_s0] sm:$0xff] }
 0x8a9   :  { %2240 = vmatmul.mubr.msk.f32.vlgmr.msra.gmra.mrb[12].mxu0 %vm466_vm1, %v814_v32 }
 0x978   :  { %v1453_v33 = vpop.f32.mrb[10].mxu0 }
 0x979   :  { %v1533_v35 = vrot.slane %v1453_v33, %v2906_v10  ;;  %v2236_v36 = vpop.f32.mrb[11].mxu0 }
 0x97b   :  { %v1534_v37 = vmul.f32 %v1533_v35, %v1293_v39  ;;  %v1535_v15 = vmul.f32 %v1533_v35, %v1294_v43  ;;  %v1536_v16 = vmul.f32 %v1533_v35, %v1295_v6  ;;  %v1537_v17 = vmul.f32 %v1533_v35, %v1296_v7 }
 0x97c   :  { %v1526_v14 = vpop.f32.mrb[12].mxu0 }
 0x97d   :  { %v1541_v2 = vrot.slane %v1526_v14, %v2906_v10  ;;  %v2241_v38 = vpop.f32.mrb[13].mxu0 }
 0x97f   :  { %v1542_v42 = vadd.f32 %v1541_v2, %v1534_v37  ;;  %v1543_v44 = vadd.f32 %v1541_v2, %v1535_v15  ;;  %v1544_v45 = vadd.f32 %v1541_v2, %v1536_v16  ;;  %v1545_v47 = vadd.f32 %v1541_v2, %v1537_v17 }
 0x981   :  { %v1550_v48 = vadd.f32 %v1546_v3, %v1542_v42  ;;  %v1551_v50 = vadd.f32 %v1547_v41, %v1543_v44  ;;  %v1552_v51 = vadd.f32 %v1544_v45, %v2652_v18  ;;  %v1553_v53 = vadd.f32 %v1545_v47, %v2658_v19 }
 0x983   :  { %vm1554_vm6 = vcmp.gt.f32.partialorder %v1550_v48, 0.0  ;;  %vm1555_vm7 = vcmp.gt.f32.partialorder %v1551_v50, 0.0  ;;  %vm1556_vm8 = vcmp.gt.f32.partialorder %v1552_v51, 0.0  ;;  %vm1557_vm9 = vcmp.gt.f32.partialorder %v1553_v53, 0.0 }
 0x984   :  { %v1558_v10 = vmul.f32 0.2, %v1550_v48  ;;  %v1559_v54 = vmul.f32 0.2, %v1551_v50  ;;  %v1560_v55 = vmul.f32 0.2, %v1552_v51 }
 0x985   :  { %v1561_v56 = vmul.f32 0.2, %v1553_v53 }
 0x986   :  { %v1562_v57 = vsel %vm1554_vm6, %v1550_v48, %v1558_v10  ;;  %v1563_v58 = vsel %vm1555_vm7, %v1551_v50, %v1559_v54  ;;  %v1564_v59 = vsel %vm1556_vm8, %v1552_v51, %v1560_v55 }
 0x987   :  { %v1565_v60 = vsel %vm1557_vm9, %v1553_v53, %v1561_v56  ;;  %1566 = vst [vmem:[%s3160_s9] sm:$0xff] %v1562_v57  ;;  %1567 = vst [vmem:[%s3160_s9 + $0x8] sm:$0xff] %v1563_v58 }
 0x988   :  { %1568 = vst [vmem:[%s3160_s9 + $0x10] sm:$0xff] %v1564_v59  ;;  %1569 = vst [vmem:[%s3160_s9 + $0x18] sm:$0xff] %v1565_v60 }

</bundles_post_ra>
